<compile_context>
chip_gen: v7x
topology: tpu7x:2x2x1
jax: 0.10.0
libtpu: 0.0.40
codegen_flags: <defaults>
</compile_context>

<pallas_src>
import jax
import jax.numpy as jnp
from jax.experimental import pallas as pl
from jax.experimental.pallas import tpu as pltpu


# ----------------------------------------------------------------------------
# Stage 1: meta_net (Linear -> ReLU -> Linear) + ctx shift, whole batch at once.
# ----------------------------------------------------------------------------
def meta_ctx_kernel(imf_ref, w1_ref, b1_ref, w2_ref, b2_ref, ctx_ref, out_ref):
    # imf_ref : (B, vis_dim)
    # w1_ref  : (vis_dim, hidden) ; b1_ref : (1, hidden)
    # w2_ref  : (hidden, ctx_dim) ; b2_ref : (1, ctx_dim)
    # ctx_ref : (n_ctx, ctx_dim)
    # out_ref : (B, n_ctx, ctx_dim) -- ctx_shifted, already in the output dtype
    x = imf_ref[...]
    h = jnp.dot(x, w1_ref[...], preferred_element_type=jnp.float32) + b1_ref[...]
    h = jnp.maximum(h, 0.0)
    bias = (jnp.dot(h.astype(w2_ref.dtype), w2_ref[...],
                    preferred_element_type=jnp.float32) + b2_ref[...])        # (B, ctx_dim) f32
    ctx_shifted = ctx_ref[...].astype(jnp.float32)[None, :, :] + bias[:, None, :]
    out_ref[...] = ctx_shifted.astype(out_ref.dtype)


# ----------------------------------------------------------------------------
# Stage 2: prompt assembly, tiled over (class-tile, batch).
# ----------------------------------------------------------------------------
def assemble_kernel(ctxs_ref, pre_ref, suf_ref, out_ref):
    # ctxs_ref: (1, n_ctx, ctx_dim)          -- ctx_shifted row for batch element b
    # pre_ref : (cls_tile, pre_len, ctx_dim) -- batch-invariant (revisited across inner b axis)
    # suf_ref : (cls_tile, suf_len, ctx_dim) -- batch-invariant (revisited across inner b axis)
    # out_ref : (1, cls_tile, seq, ctx_dim)
    n_ctx = ctxs_ref.shape[1]
    cls_tile, pre_len, ctx_dim = pre_ref.shape

    # Three lane-dense slice stores; no full-prompt materialization, no f32 round-trip.
    out_ref[0, :, 0:pre_len, :] = pre_ref[...].astype(out_ref.dtype)
    out_ref[0, :, pre_len:pre_len + n_ctx, :] = jnp.broadcast_to(
        ctxs_ref[...].astype(out_ref.dtype), (cls_tile, n_ctx, ctx_dim))
    out_ref[0, :, pre_len + n_ctx:, :] = suf_ref[...].astype(out_ref.dtype)


def _pick_cls_tile(n_cls, seq, suf_len, pre_len, ctx_dim, itemsize, budget_bytes):
    """Largest divisor of n_cls whose double-buffered (out + suffix + prefix) tiles
    fit inside `budget_bytes`.  Divisor => no partial blocks on the class axis."""
    bytes_per_cls = 2 * (seq + suf_len + pre_len) * ctx_dim * itemsize  # x2 double buffering
    max_cls = max(1, budget_bytes // max(1, bytes_per_cls))
    cls_tile = 1
    for d in range(1, n_cls + 1):
        if n_cls % d == 0 and d <= max_cls:
            cls_tile = d
    return cls_tile


def prompt_learner_forward(im_features, w1, b1, w2, b2, ctx, token_prefix, token_suffix,
                           *, cls_tile_budget_bytes=24 * 1024 * 1024):
    B, vis_dim = im_features.shape
    hidden = w1.shape[1]
    n_ctx, ctx_dim = ctx.shape
    n_cls, pre_len, _ = token_prefix.shape
    suf_len = token_suffix.shape[1]
    seq = pre_len + n_ctx + suf_len

    # Output dtype follows the frozen token-embedding dtype (clip_model.dtype in the module).
    # TODO(synk): for the PREC == 'fp16' path, pass bf16/fp16 embeddings to halve store traffic.
    out_dtype = token_prefix.dtype

    # --- Stage 1: meta-net + ctx shift over the whole batch (single pallas_call, no grid). ---
    ctx_shifted = pl.pallas_call(
        meta_ctx_kernel,
        out_shape=jax.ShapeDtypeStruct((B, n_ctx, ctx_dim), out_dtype),
    )(im_features, w1, b1.reshape(1, hidden), w2, b2.reshape(1, ctx_dim), ctx)

    # --- Stage 2: assembly kernel, grid = (class tiles, B); batch is the INNER axis so
    #     prefix/suffix blocks (index depends only on j) are not re-fetched per batch step. ---
    cls_tile = _pick_cls_tile(n_cls, seq, suf_len, pre_len, ctx_dim,
                              jnp.dtype(out_dtype).itemsize, cls_tile_budget_bytes)
    n_cls_tiles = n_cls // cls_tile

    grid_spec = pltpu.PrefetchScalarGridSpec(
        num_scalar_prefetch=0,
        grid=(n_cls_tiles, B),
        in_specs=[
            pl.BlockSpec((1, n_ctx, ctx_dim), lambda j, b: (b, 0, 0)),           # ctx_shifted[b]
            pl.BlockSpec((cls_tile, pre_len, ctx_dim), lambda j, b: (j, 0, 0)),  # prefix tile
            pl.BlockSpec((cls_tile, suf_len, ctx_dim), lambda j, b: (j, 0, 0)),  # suffix tile
        ],
        out_specs=pl.BlockSpec((1, cls_tile, seq, ctx_dim), lambda j, b: (b, j, 0, 0)),
    )

    return pl.pallas_call(
        assemble_kernel,
        out_shape=jax.ShapeDtypeStruct((B, n_cls, seq, ctx_dim), out_dtype),
        grid_spec=grid_spec,
        compiler_params=pltpu.CompilerParams(
            dimension_semantics=("parallel", "parallel"),   # 2-D parallel grid -> both TCs on v7x
            vmem_limit_bytes=48 * 1024 * 1024,              # above v5e's 16 MiB default, < v7x 64 MiB
        ),
    )(ctx_shifted, token_prefix, token_suffix)


def reference_forward(im_features, w1, b1, w2, b2, ctx, token_prefix, token_suffix):
    """Plain-JAX port of PromptLearner.forward for correctness checking."""
    h = jnp.maximum(im_features @ w1 + b1, 0.0)
    bias = h @ w2 + b2                                 # (B, ctx_dim)
    ctx_shifted = ctx[None] + bias[:, None, :]         # (B, n_ctx, ctx_dim)
    B = im_features.shape[0]
    n_cls = token_prefix.shape[0]
    pre = jnp.broadcast_to(token_prefix[None], (B,) + token_prefix.shape)
    suf = jnp.broadcast_to(token_suffix[None], (B,) + token_suffix.shape)
    ctx_b = jnp.broadcast_to(ctx_shifted[:, None], (B, n_cls) + ctx_shifted.shape[1:])
    return jnp.concatenate([pre, ctx_b, suf], axis=2)  # (B, n_cls, seq, ctx_dim)


if __name__ == "__main__":
    # Small, module-consistent shapes.
    B = 2          # batch of image features
    vis_dim = 32   # clip_model.visual.output_dim
    hidden = vis_dim // 16                      # meta_net bottleneck
    ctx_dim = 32   # clip_model.ln_final.weight.shape[0]
    n_ctx = 4      # number of learnable context tokens
    n_cls = 3      # number of classnames
    seq = 8        # total tokenized prompt length (SOS + ctx + name + EOS pad)
    suf_len = seq - 1 - n_ctx
    dtype = jnp.float32

    key = jax.random.PRNGKey(0)
    k = jax.random.split(key, 8)

    # Deterministic synthetic parameters (shapes follow __init__; no checkpoint loading).
    ctx = 0.02 * jax.random.normal(k[0], (n_ctx, ctx_dim), dtype)               # nn.init.normal_(std=0.02)
    w1 = jax.random.normal(k[1], (vis_dim, hidden), dtype) / jnp.sqrt(vis_dim)  # linear1.weight^T
    b1 = 0.01 * jax.random.normal(k[2], (hidden,), dtype)                       # linear1.bias
    w2 = jax.random.normal(k[3], (hidden, ctx_dim), dtype) / jnp.sqrt(hidden)   # linear2.weight^T
    b2 = 0.01 * jax.random.normal(k[4], (ctx_dim,), dtype)                      # linear2.bias
    # Frozen token-embedding slices (stand-ins for clip_model.token_embedding output).
    token_prefix = jax.random.normal(k[5], (n_cls, 1, ctx_dim), dtype)
    token_suffix = jax.random.normal(k[6], (n_cls, suf_len, ctx_dim), dtype)

    im_features = jax.random.normal(k[7], (B, vis_dim), dtype)

    prompts = prompt_learner_forward(
        im_features, w1, b1, w2, b2, ctx, token_prefix, token_suffix)
    prompts = jax.block_until_ready(prompts)

    expected = reference_forward(
        im_features, w1, b1, w2, b2, ctx, token_prefix, token_suffix)

    assert prompts.shape == (B, n_cls, seq, ctx_dim), prompts.shape
    assert jnp.allclose(prompts, expected, atol=1e-5, rtol=1e-5), "mismatch vs reference"
    print("KERNEL_OK")
</pallas_src>

<mosaic_0001>
module attributes {stable_mosaic.version = 11 : i64} {
  func.func @meta_ctx_kernel(%arg0: memref<2x32xf32, #tpu.memory_space<vmem>>, %arg1: memref<32x2xf32, #tpu.memory_space<vmem>>, %arg2: memref<1x2xf32, #tpu.memory_space<vmem>>, %arg3: memref<2x32xf32, #tpu.memory_space<vmem>>, %arg4: memref<1x32xf32, #tpu.memory_space<vmem>>, %arg5: memref<4x32xf32, #tpu.memory_space<vmem>>, %arg6: memref<2x4x32xf32, #tpu.memory_space<vmem>>) attributes {dimension_semantics = [], scalar_prefetch = 0 : i64, scratch_operands = 0 : i64, tpu.core_type = #tpu.core_type<tc>} {
    %c0 = arith.constant 0 : index
    %c0_0 = arith.constant 0 : index
    %0 = vector.load %arg0[%c0, %c0_0] : memref<2x32xf32, #tpu.memory_space<vmem>>, vector<2x32xf32>
    %c0_1 = arith.constant 0 : index
    %c0_2 = arith.constant 0 : index
    %1 = vector.load %arg1[%c0_1, %c0_2] : memref<32x2xf32, #tpu.memory_space<vmem>>, vector<32x2xf32>
    %cst = arith.constant dense<0.000000e+00> : vector<2x2xf32>
    %2 = tpu.matmul %0, %1, %cst {dimension_numbers = #tpu.dot_dimension_numbers<[1], [0], [0], [1], [0, 0, 1, 1], [], []>} : vector<2x32xf32>, vector<32x2xf32>, vector<2x2xf32> -> vector<2x2xf32>
    %c0_3 = arith.constant 0 : index
    %c0_4 = arith.constant 0 : index
    %3 = vector.load %arg2[%c0_3, %c0_4] : memref<1x2xf32, #tpu.memory_space<vmem>>, vector<1x2xf32>
    %4 = vector.broadcast %3 : vector<1x2xf32> to vector<2x2xf32>
    %5 = arith.addf %2, %4 : vector<2x2xf32>
    %cst_5 = arith.constant 0.000000e+00 : f32
    %6 = vector.broadcast %cst_5 : f32 to vector<2x2xf32>
    %7 = arith.maximumf %5, %6 : vector<2x2xf32>
    %c0_6 = arith.constant 0 : index
    %c0_7 = arith.constant 0 : index
    %8 = vector.load %arg3[%c0_6, %c0_7] : memref<2x32xf32, #tpu.memory_space<vmem>>, vector<2x32xf32>
    %cst_8 = arith.constant dense<0.000000e+00> : vector<2x32xf32>
    %9 = tpu.matmul %7, %8, %cst_8 {dimension_numbers = #tpu.dot_dimension_numbers<[1], [0], [0], [1], [0, 0, 1, 1], [], []>} : vector<2x2xf32>, vector<2x32xf32>, vector<2x32xf32> -> vector<2x32xf32>
    %c0_9 = arith.constant 0 : index
    %c0_10 = arith.constant 0 : index
    %10 = vector.load %arg4[%c0_9, %c0_10] : memref<1x32xf32, #tpu.memory_space<vmem>>, vector<1x32xf32>
    %11 = vector.broadcast %10 : vector<1x32xf32> to vector<2x32xf32>
    %12 = arith.addf %9, %11 : vector<2x32xf32>
    %c0_11 = arith.constant 0 : index
    %c0_12 = arith.constant 0 : index
    %13 = vector.load %arg5[%c0_11, %c0_12] : memref<4x32xf32, #tpu.memory_space<vmem>>, vector<4x32xf32>
    %14 = vector.shape_cast %13 : vector<4x32xf32> to vector<1x4x32xf32>
    %15 = vector.shape_cast %12 : vector<2x32xf32> to vector<2x1x32xf32>
    %16 = vector.broadcast %14 : vector<1x4x32xf32> to vector<2x4x32xf32>
    %17 = vector.broadcast %15 : vector<2x1x32xf32> to vector<2x4x32xf32>
    %18 = arith.addf %16, %17 : vector<2x4x32xf32>
    %c0_13 = arith.constant 0 : index
    %c0_14 = arith.constant 0 : index
    %c0_15 = arith.constant 0 : index
    %19 = vector.load %arg6[%c0_13, %c0_14, %c0_15] : memref<2x4x32xf32, #tpu.memory_space<vmem>>, vector<2x4x32xf32>
    tpu.vector_store %arg6[%c0_13, %c0_14, %c0_15], %18 {strides = array<i32>} : memref<2x4x32xf32, #tpu.memory_space<vmem>>, vector<2x4x32xf32>,
    return
  }
}

</mosaic_0001>

<bundles_post_ra>
// kernel: tpu_custom_call.1
= control target key start
LH: loop header
LB: loop body
LE: loop exit
PB: predicated region body
PF: predicated region fallthrough
CT: control target
= control target key end

     0   :  { %v317_v3 = vmov 0.0|0.0   ;;  %vm318_vm0 = vmmov 0   ;;  %v319_v6 = vmov 0.0   ;;  %s398_s0 = inlined_call_operand.vmem [shape: f32[2,32], index: 0, kind: input, shape index: {}]   ;;  %s399_s1 = inlined_call_operand.vmem [shape: f32[32,2], index: 1, kind: input, shape index: {}]   ;;  %s400_s2 = inlined_call_operand.vmem [shape: f32[1,2], index: 2, kind: input, shape index: {}]   ;;  %s401_s3 = inlined_call_operand.vmem [shape: f32[2,32], index: 3, kind: input, shape index: {}]   ;;  %s402_s4 = inlined_call_operand.vmem [shape: f32[1,32], index: 4, kind: input, shape index: {}]   ;;  %s403_s5 = inlined_call_operand.vmem [shape: f32[4,32], index: 5, kind: input, shape index: {}]   ;;  %s404_s6 = inlined_call_operand.hbm [shape: f32[2,4,32], index: 6, kind: output, shape index: {}]  }
   0x1   :  { %v25_v0 = vld [vmem:[%s399_s1] sm:$0xff]  ;;  %v26_v1 = vld [vmem:[%s399_s1 + $0x8] sm:$0xff]  ;;  %v27_v2 = vld [vmem:[%s399_s1 + $0x10] sm:$0xff]  ;;  %280 = vmatprep.subr.bf16.mxu0 %v317_v3  ;;  %272 = vmatprep.mubr.msk.f32.mxu0 %vm318_vm0, %v319_v6 }
   0x2   :  { %v281_v4 = vpack.c.bf16 %v26_v1, %v25_v0  ;;  %v28_v5 = vld [vmem:[%s399_s1 + $0x18] sm:$0xff]  ;;  %275 = vmatprep.subr.mxu1 %v319_v6  ;;  %277 = vmatprep.mubr.msk.f32.mxu1 %vm318_vm0, %v319_v6 }
   0x3   :  { %11 = vsyncpa [#allocation3], 0  ;;  %v284_v7 = vpack.c.bf16 %v28_v5, %v27_v2  ;;  %v24_v8 = vld [vmem:[%s398_s0] sm:$0x3]  ;;  %vm36_vm1 = vcmask 261120   ;;  %vm123_vm2 = vcmask 1041408   ;;  %v202_v17 = vlaneseq }
   0x4   :  { %282 = vmatpush3.bf16.msra.mxu0 %v281_v4  ;;  %v111_v9 = vld [vmem:[%s401_s3] sm:$0x3]  ;;  %vm119_vm3 = vcmask 15360   ;;  %v320_v15 = vmov 1966171168   ;;  %s321_s11 = smov [#allocation2]  }
   0x5   :  { %283 = vmatprep.subr.bf16.mxu0 %v317_v3  ;;  %276 = vmatpush3.msk.msra.mxu1 %vm123_vm2, %v111_v9  ;;  %v252_v10 = vld [vmem:[%s400_s2] ss:$0 sm:$0xff]  ;;  %v200_v16 = vunpack.c.l.s4 %v320_v15  ;;  %v203_v19 = vshrl.u32 %v202_v17, 7  ;;  %s241_s12 = sshll.u32 %s321_s11, 4  ;;  %vm233_vm4 = vcmask 257024   ;;  %s242_s12 = int_to_ptr.vmem [resolvable:$true] %s241_s12 }
   0x6   :  { %v254_v20 = vld [vmem:[%s402_s4] ss:$0 sm:$0xff]  ;;  %s293_s4 = scalar_lea.vmem %s242_s12, 128  ;;  %p298_p1 = scmp.lt.s32.totalorder %s242_s12, %s242_s12 }
   0x7   :  { %v201_v18 = vunpack.c.0.s8 %v200_v16  ;;  %v223_v26 = vsub.s32 0, %v203_v19  ;;  %v197_v29 = vld [vmem:[%s403_s5] sm:$0xf]  ;;  %p294_p0 = scmp.ne.s32.totalorder %s242_s12, %s293_s4  ;;  %p299_p2 = scmp.lt.s32.totalorder %s293_s4, %s293_s4 }
   0x8   :  { %285 = vmatpush3.bf16.msra.mxu0 %v284_v7 }
   0x9   :  { %v204_v21 = vsub.s32 %v201_v18, %v203_v19  ;;  %p300_p3 = por %p299_p2, %p298_p1 }
   0xb   :  { %273 = vmatmul.mubr.msk.f32.vlgmr.msra.gmra.mrb[0].mxu0 %vm36_vm1, %v24_v8  ;;  %p301_p4 = pnand %p300_p3, %p294_p0 }
  0xde   :  { %v106_v11 = vpop.f32.mrb[0].mxu0 }
  0xdf   :  { %v107_v12 = vadd.f32 %v252_v10, %v106_v11  ;;  %v274_v13 = vpop.f32.mrb[1].mxu0 }
  0xe1   :  { %v110_v14 = vmax.f32 %v107_v12, 0.0 }
  0xe3   :  { %278 = vmatmul.mubr.msk.f32.vlgmr.msra.gmra.mrb[0].mxu1 %vm119_vm3, %v110_v14 }
 0x1b6   :  { %v193_v22 = vpop.f32.mrb[0].mxu1 }
 0x1b7   :  { %v194_v23 = vadd.f32 %v254_v20, %v193_v22  ;;  %v279_v24 = vpop.f32.mrb[1].mxu1 }
 0x1b9   :  { %v205_v25 = vrot.slane %v194_v23, %v204_v21 }
 0x1bb   :  { %v206_v27 = vcombine.high %v205_v25, %v205_v25  ;;  %v213_v28 = vrot.slane %v205_v25, %v204_v21 }
 0x1bd   :  { %v220_v30 = vrot.slane %v206_v27, %v204_v21  ;;  %v224_v31 = vrot.slane %v213_v28, %v223_v26 }
 0x1bf   :  { %v228_v32 = vrot.slane %v220_v30, %v223_v26  ;;  %v231_v33 = vadd.f32 %v224_v31, %v197_v29 }
 0x1c1   :  { %v232_v34 = vadd.f32 %v228_v32, %v197_v29  ;;  %234 = vst.msk [vmem:[#allocation2] sm:$0xf] %vm233_vm4, %v231_v33 }
 0x1c3   :  { %235 = vst.msk [vmem:[#allocation2 + $0x4] sm:$0xf] %vm233_vm4, %v232_v34 }
 0x1c4   :  { %304 = shalt.err (!%p301_p4)
}
 0x1c5   :  { %s305_s14 = scalar_lea.hbm %s404_s6, 128 }
 0x1c6   :  { %p306_p5 = scmp.ne.s32.totalorder %s404_s6, %s305_s14  ;;  %p309_p6 = scmp.lt.u32.totalorder %s305_s14, %s404_s6 }
 0x1c8   :  { %p311_p7 = pnand %p309_p6, %p306_p5 }
 0x1ca   :  { %314 = shalt.err (!%p311_p7)
}
 0x1cb   :  { %s322_s19 = smov 64   ;;  %s323_s20 = smov 4  }
 0x1cc   :  { %247 = dma.vmem_to_hbm [thread:$0]  %s242_s12, 128, %s404_s6, [#allocation3], %s322_s19, %s322_s19, %s323_s20  }
 0x1cd   :  { %315 = dma.done.wait [#allocation3], 128  }
 0x1ce   :  { %316 = vsyncadd [#allocation3], 4294967168 }
 0x1cf   :  { %251 = vsyncpa [#allocation3], 1 }

</bundles_post_ra>
